<compile_context>
chip_gen: v5e
topology: v5e:2x2
jax: 0.10.0
libtpu: 0.0.40
codegen_flags: <defaults>
</compile_context>

<pallas_src>
import functools

import jax
import jax.numpy as jnp
import numpy as np
from jax.experimental import pallas as pl
from jax.experimental.pallas import tpu as pltpu


def _pixel_shuffle_kernel(x_ref, p_ref, o_ref, *, stride):
    # x_ref: (1, r*r, TH, W)    the r^2 input channels of ONE output channel, TH rows
    # p_ref: (W*r, W*r)         one-hot lane-permutation matrix (constant over grid)
    # o_ref: (1, 1, TH, r*r*W)  contiguous view of TH*r output rows of width W*r
    r = stride

    segments = []
    for a in range(r):
        # Xa[hh, b*W + w] = in[..., a*r + b, hh, w]    (pure lane-dim concat)
        xa = jnp.concatenate([x_ref[0, a * r + b] for b in range(r)], axis=-1)
        # Ya[hh, w*r + b] = Xa[hh, b*W + w]            (MXU does the lane shuffle)
        ya = jnp.dot(xa, p_ref[...], preferred_element_type=jnp.float32)
        segments.append(ya)
    # y[hh, a*(W*r) + w*r + b] = in[..., a*r + b, hh, w]
    y = jnp.concatenate(segments, axis=-1)             # (TH, r*r*W)
    o_ref[0, 0] = y.astype(o_ref.dtype)                # one lane-dense store


def _pick_row_tile(h):
    """Largest row tile <= 128 that is a multiple of 8 and divides H (else full H)."""
    if h <= 128 or h % 8 != 0:
        return h
    for th in (128, 96, 64, 48, 32, 24, 16, 8):
        if h % th == 0:
            return th
    return h


def dense_to_space_forward(x_nchw, stride):
    """Pallas implementation of dense_to_space.forward (PixelShuffle(stride))."""
    N, C_in, H, W = x_nchw.shape
    r = int(stride)
    if C_in % (r * r) != 0:
        raise ValueError("input channels must be divisible by stride**2")
    C = C_in // (r * r)

    if r == 1:                       # PixelShuffle(1) is the identity
        return x_nchw

    # One-hot lane-permutation matrix: P[b*W + w, w*r + b] = 1 (built once by XLA).
    j = jnp.arange(W * r)
    target = (j % W) * r + (j // W)
    perm = (target[:, None] == jnp.arange(W * r)[None, :]).astype(x_nchw.dtype)

    TH = _pick_row_tile(H)
    grid = (N, C, H // TH)

    kernel = functools.partial(_pixel_shuffle_kernel, stride=r)

    out4 = pl.pallas_call(
        kernel,
        out_shape=jax.ShapeDtypeStruct((N, C, H, r * r * W), x_nchw.dtype),
        grid_spec=pltpu.PrefetchScalarGridSpec(
            num_scalar_prefetch=0,
            grid=grid,
            in_specs=[
                # r^2 input channels of output channel c, rows [t*TH, (t+1)*TH)
                pl.BlockSpec((1, r * r, TH, W), lambda n, c, t: (n, c, t, 0)),
                # constant permutation matrix
                pl.BlockSpec((W * r, W * r), lambda n, c, t: (0, 0)),
            ],
            out_specs=pl.BlockSpec((1, 1, TH, r * r * W),
                                   lambda n, c, t: (n, c, t, 0)),
        ),
        compiler_params=pltpu.CompilerParams(
            dimension_semantics=("parallel", "parallel", "parallel")),
    )(x_nchw, perm)

    # (N, C, H, r*r*W) is exactly the contiguous row-major view of (N, C, H*r, W*r):
    # index h*(r*W*r) + a*(W*r) + w*r + b == (h*r + a)*(W*r) + (w*r + b).
    return out4.reshape(N, C, H * r, W * r)


def _reference(x, r):
    """Pure-JAX PixelShuffle mirroring PyTorch semantics."""
    N, C_in, H, W = x.shape
    C = C_in // (r * r)
    y = x.reshape(N, C, r, r, H, W)
    y = jnp.transpose(y, (0, 1, 4, 2, 5, 3))
    return y.reshape(N, C, H * r, W * r)


if __name__ == "__main__":
    # dense_to_space(stride=2) on (N=2, C*r^2=16, H=16, W=16) -> (2, 4, 32, 32)
    N, stride = 2, 2
    C_out, H, W = 4, 16, 16
    C_in = C_out * stride * stride

    key = jax.random.PRNGKey(0)
    x = jax.random.normal(key, (N, C_in, H, W), dtype=jnp.float32)

    out = dense_to_space_forward(x, stride)
    out = jax.block_until_ready(out)

    ref = _reference(x, stride)
    np.testing.assert_allclose(np.asarray(out), np.asarray(ref),
                               rtol=1e-6, atol=1e-6)

    print("KERNEL_OK")
</pallas_src>

<mosaic_0001>
module attributes {stable_mosaic.version = 11 : i64} {
  func.func @_pixel_shuffle_kernel(%arg0: i32, %arg1: i32, %arg2: i32, %arg3: memref<1x4x16x16xf32, #tpu.memory_space<vmem>>, %arg4: memref<32x32xf32, #tpu.memory_space<vmem>>, %arg5: memref<1x1x16x64xf32, #tpu.memory_space<vmem>>) attributes {dimension_semantics = [#tpu.dimension_semantics<parallel>, #tpu.dimension_semantics<parallel>, #tpu.dimension_semantics<parallel>], iteration_bounds = array<i64: 2, 4, 1>, scalar_prefetch = 0 : i64, scratch_operands = 0 : i64, tpu.core_type = #tpu.core_type<tc>, window_params = [{transform_indices = @transform_0, window_bounds = array<i64: 1, 4, 16, 16>}, {pipeline_mode = #tpu.pipeline_mode<synchronous>, transform_indices = @transform_1, window_bounds = array<i64: 32, 32>}, {transform_indices = @transform_2, window_bounds = array<i64: 1, 1, 16, 64>}]} {
    %c0 = arith.constant 0 : index
    %c0_0 = arith.constant 0 : index
    %c0_1 = arith.constant 0 : index
    %c0_2 = arith.constant 0 : index
    %0 = vector.load %arg3[%c0, %c0_0, %c0_1, %c0_2] : memref<1x4x16x16xf32, #tpu.memory_space<vmem>>, vector<1x1x16x16xf32>
    %1 = vector.shape_cast %0 : vector<1x1x16x16xf32> to vector<16x16xf32>
    %c0_3 = arith.constant 0 : index
    %c1 = arith.constant 1 : index
    %c0_4 = arith.constant 0 : index
    %c0_5 = arith.constant 0 : index
    %2 = vector.load %arg3[%c0_3, %c1, %c0_4, %c0_5] : memref<1x4x16x16xf32, #tpu.memory_space<vmem>>, vector<1x1x16x16xf32>
    %3 = vector.shape_cast %2 : vector<1x1x16x16xf32> to vector<16x16xf32>
    %4 = tpu.concatenate %1, %3 in 1 : vector<16x16xf32>, vector<16x16xf32> -> vector<16x32xf32>
    %c0_6 = arith.constant 0 : index
    %c0_7 = arith.constant 0 : index
    %5 = vector.load %arg4[%c0_6, %c0_7] : memref<32x32xf32, #tpu.memory_space<vmem>>, vector<32x32xf32>
    %cst = arith.constant dense<0.000000e+00> : vector<16x32xf32>
    %6 = tpu.matmul %4, %5, %cst {dimension_numbers = #tpu.dot_dimension_numbers<[1], [0], [0], [1], [0, 0, 1, 1], [], []>} : vector<16x32xf32>, vector<32x32xf32>, vector<16x32xf32> -> vector<16x32xf32>
    %c0_8 = arith.constant 0 : index
    %c2 = arith.constant 2 : index
    %c0_9 = arith.constant 0 : index
    %c0_10 = arith.constant 0 : index
    %7 = vector.load %arg3[%c0_8, %c2, %c0_9, %c0_10] : memref<1x4x16x16xf32, #tpu.memory_space<vmem>>, vector<1x1x16x16xf32>
    %8 = vector.shape_cast %7 : vector<1x1x16x16xf32> to vector<16x16xf32>
    %c0_11 = arith.constant 0 : index
    %c3 = arith.constant 3 : index
    %c0_12 = arith.constant 0 : index
    %c0_13 = arith.constant 0 : index
    %9 = vector.load %arg3[%c0_11, %c3, %c0_12, %c0_13] : memref<1x4x16x16xf32, #tpu.memory_space<vmem>>, vector<1x1x16x16xf32>
    %10 = vector.shape_cast %9 : vector<1x1x16x16xf32> to vector<16x16xf32>
    %11 = tpu.concatenate %8, %10 in 1 : vector<16x16xf32>, vector<16x16xf32> -> vector<16x32xf32>
    %c0_14 = arith.constant 0 : index
    %c0_15 = arith.constant 0 : index
    %12 = vector.load %arg4[%c0_14, %c0_15] : memref<32x32xf32, #tpu.memory_space<vmem>>, vector<32x32xf32>
    %cst_16 = arith.constant dense<0.000000e+00> : vector<16x32xf32>
    %13 = tpu.matmul %11, %12, %cst_16 {dimension_numbers = #tpu.dot_dimension_numbers<[1], [0], [0], [1], [0, 0, 1, 1], [], []>} : vector<16x32xf32>, vector<32x32xf32>, vector<16x32xf32> -> vector<16x32xf32>
    %14 = tpu.concatenate %6, %13 in 1 : vector<16x32xf32>, vector<16x32xf32> -> vector<16x64xf32>
    %c0_17 = arith.constant 0 : index
    %c0_18 = arith.constant 0 : index
    %c0_19 = arith.constant 0 : index
    %c0_20 = arith.constant 0 : index
    %15 = vector.load %arg5[%c0_17, %c0_18, %c0_19, %c0_20] : memref<1x1x16x64xf32, #tpu.memory_space<vmem>>, vector<1x1x16x64xf32>
    %16 = vector.shape_cast %15 : vector<1x1x16x64xf32> to vector<16x64xf32>
    %17 = vector.shape_cast %14 : vector<16x64xf32> to vector<1x1x16x64xf32>
    tpu.vector_store %arg5[%c0_17, %c0_18, %c0_19, %c0_20], %17 {strides = array<i32>} : memref<1x1x16x64xf32, #tpu.memory_space<vmem>>, vector<1x1x16x64xf32>,
    return
  }
  func.func @transform_0(%arg0: i32, %arg1: i32, %arg2: i32) -> (i32, i32, i32, i32) {
    %c0_i32 = arith.constant 0 : i32
    %c0_i32_0 = arith.constant 0 : i32
    return %arg0, %arg1, %arg2, %c0_i32 : i32, i32, i32, i32
  }
  func.func @transform_1(%arg0: i32, %arg1: i32, %arg2: i32) -> (i32, i32) {
    %c0_i32 = arith.constant 0 : i32
    %c0_i32_0 = arith.constant 0 : i32
    %c0_i32_1 = arith.constant 0 : i32
    return %c0_i32, %c0_i32_0 : i32, i32
  }
  func.func @transform_2(%arg0: i32, %arg1: i32, %arg2: i32) -> (i32, i32, i32, i32) {
    %c0_i32 = arith.constant 0 : i32
    %c0_i32_0 = arith.constant 0 : i32
    return %arg0, %arg1, %arg2, %c0_i32 : i32, i32, i32, i32
  }
}

</mosaic_0001>

<bundles_post_ra>
// kernel: tpu_custom_call.1
= control target key start
LH: loop header
LB: loop body
LE: loop exit
PB: predicated region body
PF: predicated region fallthrough
CT: control target
= control target key end

     0   :  { %s961_s0 = inlined_call_operand.hbm [shape: f32[2,16,16,16], index: 0, kind: input, shape index: {}]   ;;  %s962_s1 = inlined_call_operand.hbm [shape: f32[32,32], index: 1, kind: input, shape index: {}]   ;;  %s963_s2 = inlined_call_operand.hbm [shape: f32[2,4,16,64], index: 2, kind: output, shape index: {}]  }
   0x1   :  { %970 = sst [smem:[#allocation15_spill]] %s962_s1 }
   0x2   :  { %7 = vsyncpa [#allocation3], 0 }
   0x3   :  { %9 = vsyncpa [#allocation3 + $0x1], 0 }
   0x4   :  { %10 = vsyncpa [#allocation6], 0 }
   0x5   :  { %11 = vsyncpa [#allocation4], 0 }
   0x6   :  { %13 = vsyncpa [#allocation4 + $0x1], 0  ;;  %s771_s9 = smov 0   ;;  %s773_s10 = smov 0  }
   0x7   :  { %s775_s11 = smov 0   ;;  %s777_s12 = smov 0  }
   0x8   :  { %s779_s13 = smov 0   ;;  %s781_s14 = smov 0  }
   0x9   :  { %s783_s15 = smov 0   ;;  %s785_s16 = smov 0  }
   0xa LB: > { %971 = sst [smem:[#allocation11_spill]] %s719_s9  ;;  %s451_s17 = sadd.s32 4294967295, %s747_s16   ;;  %s747_s16 = sphi %s785_s16, %s19_s16   ;;  %s743_s15 = sphi %s783_s15, %s994_s15   ;;  %s739_s14 = sphi %s781_s14, %s993_s14   ;;  %s735_s13 = sphi %s779_s13, %s992_s13   ;;  %s731_s12 = sphi %s777_s12, %s991_s12   ;;  %s727_s11 = sphi %s775_s11, %s990_s11   ;;  %s723_s10 = sphi %s773_s10, %s989_s10   ;;  %s719_s9 = sphi %s771_s9, %s988_s9  }
   0xb   : > { %s452_s18 = sadd.s32 4294967294, %s747_s16   ;;  %p62_p0 = scmp.ne.s32.totalorder %s723_s10, %s719_s9 }
   0xc   : > { %p815_p1 = scmp.eq.s32.totalorder %s451_s17, 0  ;;  %p117_p2 = scmp.eq.s32.totalorder %s452_s18, 7 }
   0xd   : > { %p453_p4 = scmp.ge.s32.totalorder %s747_s16, 1  ;;  %p124_p6 = scmp.lt.s32.totalorder %s747_s16, 9 }
   0xe   : > { %p821_p3 = por %p815_p1, %p62_p0  ;;  %p826_p5 = por %p117_p2, %p62_p0 }
   0xf   : > { %s976_s1 = sld [smem:[#allocation15_spill]]  ;;  %p834_p7 = pnand %p453_p4, %p124_p6 }
  0x10   : > { %s974_s21 = scalar_select %p826_p5, 1, 0 }
  0x11   : > { %p498_p8 = pneg %p834_p7  ;;  %s749_s26 = smov [#allocation5]  }
  0x12   : > { %975 = sst [smem:[#allocation12_spill]] %s974_s21  ;;  %s137_s27 = sshll.u32 %s749_s26, 4  ;;  %s138_s27 = int_to_ptr.vmem [resolvable:$true] %s137_s27 }
  0x13   : > { %p499_p9 = pnand %p498_p8, %p815_p1  ;;  %s964_s28 = smov 128  }
  0x14   : > { %s965_s29 = smov 8   ;;  %s34_s30 = sadd.s32 1, %s739_s14 }
  0x15   : > { %s135_s24 = sshll.u32 %s976_s1, 4  ;;  %p36_p10 = scmp.ge.s32.totalorder %s34_s30, 4  ;;  %s136_s24 = int_to_ptr.hbm [resolvable:$true] %s135_s24 }
  0x16   : > { %501 = dma.hbm_to_vmem [thread:$0]  (!%p499_p9), %s136_s24, 512, %s138_s27, [#allocation6], %s964_s28, %s964_s28, %s965_s29  }
  0x17   : > { %s38_s3 = sadd.s32 1, %s743_s15  ;;  %p111_p11 = scmp.eq.s32.totalorder %s451_s17, 7 }
  0x18   : > { %p56_p12 = scmp.ne.s32.totalorder %s727_s11, %s723_s10  ;;  %s996_s30 = smov (%p36_p10, %s34_s30), 0 }
  0x19   : > { %978 = sst [smem:[#allocation13_spill]] %s996_s30  ;;  %s998_s3 = smov (!%p36_p10, %s38_s3), %s743_s15 }
  0x1a   : > { %s49_s4 = sadd.s32 1, %s727_s11  ;;  %p57_p13 = scmp.eq.s32.totalorder %s747_s16, 0 }
  0x1b   : > { %p40_p0 = scmp.ge.s32.totalorder %s998_s3, 2  ;;  %p854_p2 = por %p111_p11, %p56_p12 }
  0x1c   : > { %s43_s6 = ssub.s32 %s739_s14, %s996_s30  ;;  %p860_p4 = por %p57_p13, %p56_p12 }
  0x1d   : > { %s1000_s3 = smov (%p40_p0, %s998_s3), 0  ;;  %p511_p6 = scmp.lt.s32.totalorder %s747_s16, 8 }
  0x1e   : > { %981 = sst [smem:[#allocation14_spill]] %s1000_s3  ;;  %s151_s8 = sand.u32 1, %s727_s11  }
  0x1f   : > { %s42_s17 = ssub.s32 %s743_s15, %s1000_s3  ;;  %s481_s18 = sshll.u32 %s739_s14, 3 }
  0x20   : > { %s44_s22 = sor.u32 %s43_s6, %s42_s17  ;;  %s456_s23 = sshll.u32 %s151_s8, 6 }
  0x21   : > { %p47_p8 = scmp.eq.s32.totalorder %s44_s22, 0  ;;  %s459_s24 = sshll.u32 %s743_s15, 5 }
  0x22   : > { %s155_s26 = scalar_lea.vmem [#allocation2], %s456_s23  ;;  %s163_s29 = sadd.s32 %s481_s18, %s459_s24 }
  0x23   : > { %s168_s27 = sshll.u32 %s155_s26, 4  ;;  %s460_s1 = sshll.u32 %s163_s29, 3  ;;  %s169_s27 = int_to_ptr.vmem [resolvable:$true] %s168_s27 }
  0x24   : > { %s873_s28 = scalar_select %p47_p8, %s727_s11, %s49_s4  }
  0x25   : > { %p503_p9 = pnand %p511_p6, %p860_p4  ;;  %s165_s9 = scalar_lea.hbm %s961_s0, %s460_s1 }
  0x26   : > { %s166_s3 = sshll.u32 %s165_s9, 4  ;;  %s152_s6 = scalar_lea.sflag [#allocation3], %s151_s8  ;;  %s167_s3 = int_to_ptr.hbm [resolvable:$true] %s166_s3 }
  0x27   : > { %s982_s17 = smov 8   ;;  %s983_s22 = smov 128  }
  0x28   : > { %505 = dma.hbm_to_vmem [thread:$0]  (!%p503_p9), %s167_s3, 1024, %s169_s27, %s152_s6, %s983_s22, %s983_s22, %s982_s17  }
  0x29   : > { %180 = sbr.rel (%p834_p7) target bundleno = 404 (0x194), region = 28  ;;  %s888_s29 = sand.u32 (!%p834_p7), 1, %s723_s10  }
  0x2a   : > { %s462_s4 = sshll.u32 (!%p834_p7), %s888_s29, 6  ;;  %s183_s21 = scalar_lea.sflag (!%p834_p7), [#allocation3], %s888_s29 }
  0x2b   : > { %s892_s1 = scalar_lea.vmem (!%p834_p7), [#allocation2], %s462_s4 }
  0x2e   : > { %706 = dma.done.wait (%p821_p3), %s183_s21, 1024  }
  0x2f   : > { %708 = vsyncadd (%p821_p3), %s183_s21, 4294966272 }
  0x30   : > { %710 = dma.done.wait (%p815_p1), [#allocation6], 512  }
  0x31   : > { %712 = vsyncadd (%p815_p1), [#allocation6], 4294966784  ;;  %v472_v0 = vld [vmem:[%s892_s1 + $0x38] sm:$0xff]  ;;  %s752_s9 = smov 16   ;;  %v234_v3 = vld [vmem:[#allocation5 + $0x10] sm:$0xff]  ;;  %vm229_vm0 = vcmask 130048  }
  0x32   : > { %v466_v1 = vld [vmem:[%s892_s1 + $0x18] sm:$0xff]  ;;  %276 = vrot.lane.b32.xlu0 %v472_v0, %s752_s9  ;;  %v233_v4 = vld [vmem:[#allocation5 + $0x8] sm:$0xff]  ;;  %v471_v5 = vld [vmem:[%s892_s1 + $0x30] sm:$0xff]  ;;  %vm236_vm1 = vcmask 261120   ;;  %s753_s19 = smov 32   ;;  %s476_s20 = sshll.u32 %s731_s12, 1 }
  0x33   : > { %225 = vrot.lane.b32.xlu1 %v466_v1, %s752_s9  ;;  %v235_v2 = vld [vmem:[#allocation5 + $0x18] sm:$0xff]  ;;  %v465_v6 = vld [vmem:[%s892_s1 + $0x10] sm:$0xff]  ;;  %v232_v7 = vld [vmem:[#allocation5] sm:$0xff]  ;;  %s477_s25 = sshll.u32 %s735_s13, 3  ;;  %s464_s3 = sshll.u32 %s888_s29, 4  ;;  %vm321_vm2 = vcmask 523264  }
  0x34   : > { %486 = vmatpush.msra.mxu3 %v235_v2  ;;  %300 = vmatpush.msra.mxu1 %v235_v2  ;;  %v470_v8 = vld [vmem:[%s892_s1 + $0x28] sm:$0xff]  ;;  %v469_v14 = vld [vmem:[%s892_s1 + $0x20] sm:$0xff]  ;;  %s338_s30 = sadd.s32 %s477_s25, %s476_s20  ;;  %s212_s24 = scalar_lea.vmem [#allocation7], %s464_s3 }
  0x35   : > { %255 = vmatpush.msra.mxu0 %v235_v2  ;;  %482 = vmatpush.msra.mxu2 %v235_v2  ;;  %v217_v9 = vld [vmem:[%s892_s1 + $0x8] sm:$0xff]  ;;  %v216_v15 = vld [vmem:[%s892_s1] sm:$0xff]  ;;  %s478_s7 = sshll.u32 %s338_s30, 3  ;;  %s341_s26 = sshll.u32 %s212_s24, 4  ;;  %s342_s26 = int_to_ptr.vmem [resolvable:$true] %s341_s26 }
  0x36   : > { %487 = vmatpush.msra.mxu3 %v234_v3  ;;  %301 = vmatpush.msra.mxu1 %v234_v3  ;;  %s340_s23 = scalar_lea.hbm %s963_s2, %s478_s7  ;;  %s325_s12 = scalar_lea.sflag [#allocation4], %s888_s29 }
  0x37   : > { %256 = vmatpush.msra.mxu0 %v234_v3  ;;  %483 = vmatpush.msra.mxu2 %v234_v3  ;;  %s343_s27 = sshll.u32 %s340_s23, 4  ;;  %s665_s4 = scalar_lea.hbm %s963_s2, 128  ;;  %s344_s27 = int_to_ptr.hbm [resolvable:$true] %s343_s27 }
  0x38   : > { %488 = vmatpush.msra.mxu3 %v233_v4  ;;  %302 = vmatpush.msra.mxu1 %v233_v4  ;;  %s659_s13 = sshra.s32 %s344_s27, 4  ;;  %s660_s13 = int_to_ptr.hbm [resolvable:$true] %s659_s13 }
  0x39   : > { %257 = vmatpush.msra.mxu0 %v233_v4  ;;  %484 = vmatpush.msra.mxu2 %v233_v4  ;;  %s661_s6 = scalar_lea.hbm %s660_s13, 16  ;;  %p666_p10 = scmp.lt.s32.totalorder %s660_s13, %s963_s2 }
  0x3a   : > { %274 = vrot.lane.b32.xlu0 %v471_v5, %s752_s9  ;;  %489 = vmatpush.msra.mxu3 %v232_v7  ;;  %p662_p1 = scmp.ne.s32.totalorder %s660_s13, %s661_s6  ;;  %p667_p11 = scmp.lt.s32.totalorder %s665_s4, %s661_s6 }
  0x3b   : > { %223 = vrot.lane.b32.xlu1 %v465_v6, %s752_s9  ;;  %303 = vmatpush.msra.mxu1 %v232_v7 }
  0x3c   : > { %258 = vmatpush.msra.mxu0 %v232_v7  ;;  %485 = vmatpush.msra.mxu2 %v232_v7  ;;  %p663_p3 = pnand %p662_p1, %p854_p2  ;;  %p668_p12 = por %p667_p11, %p666_p10 }
  0x3e   : > { %p664_p7 = pneg %p663_p3 }
  0x40   : > { %p669_p13 = pnand %p668_p12, %p664_p7 }
  0xa4   : > { %v277_v10 = vpop.permute.xlu0 %276 }
  0xa5   : > { %v226_v11 = vpop.permute.xlu1 %225  ;;  %v281_v12 = vsel %vm229_vm0, %v470_v8, %v277_v10 }
  0xa6   : > { %v231_v13 = vsel %vm229_vm0, %v217_v9, %v226_v11  ;;  %474 = vmatmul.msk.f32.vlgmr.msra.gmra.mxu3 %vm236_vm1, %v281_v12 }
  0xa7   : > { %468 = vmatmul.msk.f32.vlgmr.msra.gmra.mxu2 %vm236_vm1, %v231_v13 }
  0xac   : > { %v275_v16 = vpop.permute.xlu0 %274 }
  0xad   : > { %v224_v17 = vpop.permute.xlu1 %223  ;;  %v280_v18 = vsel %vm229_vm0, %v469_v14, %v275_v16 }
  0xae   : > { %v230_v19 = vsel %vm229_vm0, %v216_v15, %v224_v17  ;;  %473 = vmatmul.msk.f32.vlgmr.msra.gmra.mxu1 %vm236_vm1, %v280_v18 }
  0xaf   : > { %467 = vmatmul.msk.f32.vlgmr.msra.gmra.mxu0 %vm236_vm1, %v230_v19 }
 0x129   : > { %v308_v21 = vpop.f32.mrf.mxu3 }
 0x12a   : > { %v263_v25 = vpop.f32.mrf.mxu2 }
 0x12b   : > { %v305_v20 = vpop.f32.mrf.mxu1 }
 0x12c   : > { %313 = vrot.lane.b32.xlu2 %v305_v20, %s753_s19  ;;  %v260_v22 = vpop.f32.mrf.mxu0 }
 0x134   : > { %315 = vrot.lane.b32.xlu2 %v308_v21, %s753_s19 }
 0x186   : > { %v314_v23 = vpop.permute.xlu2 %313 }
 0x187   : > { %v319_v24 = vsel %vm236_vm1, %v260_v22, %v314_v23 }
 0x188   : > { %322 = vst.msk [vmem:[%s212_s24] sm:$0xff] %vm321_vm2, %v319_v24 }
 0x18e   : > { %v316_v26 = vpop.permute.xlu2 %315 }
 0x18f   : > { %v320_v27 = vsel %vm236_vm1, %v263_v25, %v316_v26 }
 0x190   : > { %323 = vst.msk [vmem:[%s212_s24 + $0x8] sm:$0xff] %vm321_vm2, %v320_v27 }
 0x191   : > { %672 = shalt.err (!%p669_p13)
}
 0x192   : > { %s754_s29 = smov 128   ;;  %s755_s9 = smov 8  }
 0x193   : > { %496 = dma.vmem_to_hbm [thread:$0]  (%p854_p2), %s342_s26, 256, %s344_s27, %s325_s12, %s754_s29, %s754_s29, %s755_s9  }
 0x194 PF: > { %s984_s19 = sld [smem:[#allocation11_spill]]  ;;  %p513_p0 = scmp.ge.s32.totalorder %s747_s16, 2 }
 0x196   : > { %p507_p4 = pnand %p513_p0, %p826_p5 }
 0x198   : > { %p508_p6 = pneg %p507_p4 }
 0x19a   : > { %s358_s25 = sand.u32 1, %s984_s19  }
 0x19b   : > { %s359_s30 = scalar_lea.sflag [#allocation4], %s358_s25 }
 0x19c   : > { %714 = dma.done.wait (%p508_p6), %s359_s30, 256  }
 0x19d   : > { %716 = vsyncadd (%p508_p6), %s359_s30, 4294967040  ;;  %s19_s16 = sadd.s32 1, %s747_s16   ;;  %s986_s5 = sld [smem:[#allocation13_spill]] }
 0x19e   : > { %p16_p8 = scmp.ge.s32.totalorder %s19_s16, 10   ;;  %s987_s3 = sld [smem:[#allocation14_spill]] }
 0x19f   : > { %s988_s9 = smov %s723_s10  ;;  %s989_s10 = smov %s727_s11 }
 0x1a0   : > { %s990_s11 = smov %s873_s28  ;;  %s991_s12 = smov %s739_s14 }
 0x1a1   : > { %s992_s13 = smov %s743_s15  ;;  %18 = sbr.rel (!%p16_p8) target bundleno = 10 (0xa), region = 80 }
 0x1a3   : > { %s993_s14 = smov %s986_s5 }
 0x1a4   : > { %s994_s15 = smov %s987_s3 }
 0x1a6   :  { %365 = vsyncpa [#allocation3], 1 }
 0x1a7   :  { %367 = vsyncpa [#allocation3 + $0x1], 1 }
 0x1a8   :  { %368 = vsyncpa [#allocation6], 1 }
 0x1a9   :  { %369 = vsyncpa [#allocation4], 1 }
 0x1aa   :  { %371 = vsyncpa [#allocation4 + $0x1], 1 }

</bundles_post_ra>
